<compile_context>
chip_gen: v5e
topology: v5e:2x2
jax: 0.10.0
libtpu: 0.0.40
codegen_flags: <defaults>
</compile_context>

<pallas_src>
import functools

import jax
import jax.numpy as jnp
from jax.experimental import pallas as pl
from jax.experimental.pallas import tpu as pltpu


def _round_up(n, m):
    return ((n + m - 1) // m) * m


def fc_layer_kernel(x_ref, w1_ref, w2_ref, o_ref):
    # x_ref: (TM, c_in) bf16, w1_ref: (c_in, hp) bf16, w2_ref: (hp, c_in) bf16
    h = jnp.dot(x_ref[...], w1_ref[...], preferred_element_type=jnp.float32)
    h = jnp.maximum(h, 0.0)                                     # ReLU (f32)
    y = jnp.dot(h.astype(w2_ref.dtype), w2_ref[...],
                preferred_element_type=jnp.float32)
    y = jnp.maximum(y, 0.0)                                     # ReLU (f32)
    o_ref[...] = y.astype(o_ref.dtype)


def prepare_fc_params(w1, w2, compute_dtype=jnp.bfloat16):
    """Convert PyTorch-layout weights once (do NOT redo this per call).

    w1: (hidden, c_in)  -> w1t: (c_in, hidden_pad)   [zero-padded cols]
    w2: (c_in, hidden)  -> w2t: (hidden_pad, c_in)   [zero-padded rows]
    Zero padding of the hidden dim is exact: padded h columns are 0, ReLU(0)=0,
    and the padded W2t rows multiply those zeros.
    """
    hidden, c_in = w1.shape
    hp = _round_up(hidden, 128)
    w1t = jnp.zeros((c_in, hp), compute_dtype).at[:, :hidden].set(
        w1.T.astype(compute_dtype))
    w2t = jnp.zeros((hp, c_in), compute_dtype).at[:hidden, :].set(
        w2.T.astype(compute_dtype))
    return w1t, w2t


@functools.partial(jax.jit, static_argnames=("tm",))
def fc_layer(x, w1t, w2t, *, tm=2048):
    """x: (..., c_in); w1t: (c_in, hp), w2t: (hp, c_in) from prepare_fc_params."""
    c_in = x.shape[-1]
    hp = w1t.shape[1]
    lead = x.shape[:-1]
    compute_dtype = w1t.dtype

    x2d = x.reshape(-1, c_in).astype(compute_dtype)
    M = x2d.shape[0]

    # Choose a row-tile that is a multiple of 8 and no larger than needed,
    # then pad M up to a multiple of TM (pad rows are discarded afterwards).
    TM = min(tm, _round_up(M, 8))
    M_pad = _round_up(M, TM)
    if M_pad != M:
        x2d = jnp.pad(x2d, ((0, M_pad - M), (0, 0)))

    n_tiles = M_pad // TM

    bytes_accessed = (
        x2d.size * x2d.dtype.itemsize
        + M_pad * c_in * jnp.dtype(x.dtype).itemsize
        + w1t.size * w1t.dtype.itemsize
        + w2t.size * w2t.dtype.itemsize
    )
    cost = pl.CostEstimate(
        flops=4 * M_pad * c_in * hp,
        transcendentals=0,
        bytes_accessed=bytes_accessed,
    )

    out = pl.pallas_call(
        fc_layer_kernel,
        out_shape=jax.ShapeDtypeStruct((M_pad, c_in), x.dtype),
        grid_spec=pl.GridSpec(
            grid=(n_tiles,),
            in_specs=[
                pl.BlockSpec((TM, c_in), lambda i: (i, 0)),     # streamed rows
                pl.BlockSpec((c_in, hp), lambda i: (0, 0)),     # resident W1t
                pl.BlockSpec((hp, c_in), lambda i: (0, 0)),     # resident W2t
            ],
            out_specs=pl.BlockSpec((TM, c_in), lambda i: (i, 0)),
        ),
        compiler_params=pltpu.CompilerParams(
            dimension_semantics=("parallel",),                  # 2 TCs on v7x
        ),
        cost_estimate=cost,
    )(x2d, w1t, w2t)

    return out[:M].reshape(*lead, c_in)


def init_fc_params(key, c_in, reduction):
    """Deterministic init mimicking nn.Linear default (uniform +/- 1/sqrt(fan_in))."""
    hidden = c_in // reduction
    k1, k2 = jax.random.split(key)
    b1 = 1.0 / jnp.sqrt(jnp.float32(c_in))
    b2 = 1.0 / jnp.sqrt(jnp.float32(hidden))
    w1 = jax.random.uniform(k1, (hidden, c_in), jnp.float32, -b1, b1)   # fc[0].weight
    w2 = jax.random.uniform(k2, (c_in, hidden), jnp.float32, -b2, b2)   # fc[2].weight
    return w1, w2


if __name__ == "__main__":
    key = jax.random.PRNGKey(0)
    kx, kw = jax.random.split(key)

    # Small shapes consistent with FCLayer: c_in=256, reduction=4 -> hidden=64.
    B, S, c_in, reduction = 2, 8, 256, 4
    x = jax.random.normal(kx, (B, S, c_in), jnp.float32)
    w1, w2 = init_fc_params(kw, c_in, reduction)

    # One-time weight prep (transpose + hidden pad to 128 + bf16 cast).
    w1t, w2t = prepare_fc_params(w1, w2)

    y = fc_layer(x, w1t, w2t)
    y = jax.block_until_ready(y)
    assert y.shape == x.shape

    # Reference 1: same bf16-input path in plain JAX (tight tolerance).
    xb = x.reshape(-1, c_in).astype(jnp.bfloat16)
    h_ref = jnp.maximum(
        jnp.dot(xb, w1t, preferred_element_type=jnp.float32), 0.0)
    ref_bf16 = jnp.maximum(
        jnp.dot(h_ref.astype(jnp.bfloat16), w2t,
                preferred_element_type=jnp.float32), 0.0).reshape(x.shape)
    assert jnp.allclose(y, ref_bf16.astype(x.dtype), atol=1e-3, rtol=1e-3)

    # Reference 2: full-f32 PyTorch-module math (loose tolerance for bf16 cast).
    ref_f32 = jnp.maximum(jnp.maximum(x @ w1.T, 0.0) @ w2.T, 0.0)
    assert jnp.allclose(y, ref_f32, atol=5e-2, rtol=5e-2)

    print("KERNEL_OK")
</pallas_src>

<mosaic_0001>
module attributes {stable_mosaic.version = 11 : i64} {
  func.func @fc_layer_kernel(%arg0: i32, %arg1: memref<16x256xbf16, #tpu.memory_space<vmem>>, %arg2: memref<256x128xbf16, #tpu.memory_space<vmem>>, %arg3: memref<128x256xbf16, #tpu.memory_space<vmem>>, %arg4: memref<16x256xf32, #tpu.memory_space<vmem>>) attributes {dimension_semantics = [#tpu.dimension_semantics<parallel>], iteration_bounds = array<i64: 1>, scalar_prefetch = 0 : i64, scratch_operands = 0 : i64, tpu.core_type = #tpu.core_type<tc>, window_params = [{transform_indices = @transform_0, window_bounds = array<i64: 16, 256>}, {pipeline_mode = #tpu.pipeline_mode<synchronous>, transform_indices = @transform_1, window_bounds = array<i64: 256, 128>}, {pipeline_mode = #tpu.pipeline_mode<synchronous>, transform_indices = @transform_2, window_bounds = array<i64: 128, 256>}, {transform_indices = @transform_3, window_bounds = array<i64: 16, 256>}]} {
    %c0 = arith.constant 0 : index
    %c0_0 = arith.constant 0 : index
    %0 = vector.load %arg1[%c0, %c0_0] : memref<16x256xbf16, #tpu.memory_space<vmem>>, vector<16x256xbf16>
    %c0_1 = arith.constant 0 : index
    %c0_2 = arith.constant 0 : index
    %1 = vector.load %arg2[%c0_1, %c0_2] : memref<256x128xbf16, #tpu.memory_space<vmem>>, vector<256x128xbf16>
    %cst = arith.constant dense<0.000000e+00> : vector<16x128xf32>
    %2 = tpu.matmul %0, %1, %cst {dimension_numbers = #tpu.dot_dimension_numbers<[1], [0], [0], [1], [0, 0, 1, 1], [], []>} : vector<16x256xbf16>, vector<256x128xbf16>, vector<16x128xf32> -> vector<16x128xf32>
    %cst_3 = arith.constant 0.000000e+00 : f32
    %3 = vector.broadcast %cst_3 : f32 to vector<16x128xf32>
    %4 = arith.maximumf %2, %3 : vector<16x128xf32>
    %5 = arith.truncf %4 : vector<16x128xf32> to vector<16x128xbf16>
    %c0_4 = arith.constant 0 : index
    %c0_5 = arith.constant 0 : index
    %6 = vector.load %arg3[%c0_4, %c0_5] : memref<128x256xbf16, #tpu.memory_space<vmem>>, vector<128x256xbf16>
    %cst_6 = arith.constant dense<0.000000e+00> : vector<16x256xf32>
    %7 = tpu.matmul %5, %6, %cst_6 {dimension_numbers = #tpu.dot_dimension_numbers<[1], [0], [0], [1], [0, 0, 1, 1], [], []>} : vector<16x128xbf16>, vector<128x256xbf16>, vector<16x256xf32> -> vector<16x256xf32>
    %cst_7 = arith.constant 0.000000e+00 : f32
    %8 = vector.broadcast %cst_7 : f32 to vector<16x256xf32>
    %9 = arith.maximumf %7, %8 : vector<16x256xf32>
    %c0_8 = arith.constant 0 : index
    %c0_9 = arith.constant 0 : index
    %10 = vector.load %arg4[%c0_8, %c0_9] : memref<16x256xf32, #tpu.memory_space<vmem>>, vector<16x256xf32>
    tpu.vector_store %arg4[%c0_8, %c0_9], %9 {strides = array<i32>} : memref<16x256xf32, #tpu.memory_space<vmem>>, vector<16x256xf32>,
    return
  }
  func.func @transform_0(%arg0: i32) -> (i32, i32) {
    %c0_i32 = arith.constant 0 : i32
    %c0_i32_0 = arith.constant 0 : i32
    return %arg0, %c0_i32 : i32, i32
  }
  func.func @transform_1(%arg0: i32) -> (i32, i32) {
    %c0_i32 = arith.constant 0 : i32
    %c0_i32_0 = arith.constant 0 : i32
    %c0_i32_1 = arith.constant 0 : i32
    return %c0_i32, %c0_i32_0 : i32, i32
  }
  func.func @transform_2(%arg0: i32) -> (i32, i32) {
    %c0_i32 = arith.constant 0 : i32
    %c0_i32_0 = arith.constant 0 : i32
    %c0_i32_1 = arith.constant 0 : i32
    return %c0_i32, %c0_i32_0 : i32, i32
  }
  func.func @transform_3(%arg0: i32) -> (i32, i32) {
    %c0_i32 = arith.constant 0 : i32
    %c0_i32_0 = arith.constant 0 : i32
    return %arg0, %c0_i32 : i32, i32
  }
}

</mosaic_0001>

<bundles_post_ra>
// kernel: fc_layer.1
= control target key start
LH: loop header
LB: loop body
LE: loop exit
PB: predicated region body
PF: predicated region fallthrough
CT: control target
= control target key end

     0   :  { %8 = vsyncpa [#allocation3], 0  ;;  %s677_s0 = inlined_call_operand.vmem [shape: bf16[16,256], index: 0, kind: input, shape index: {}]   ;;  %s678_s1 = inlined_call_operand.hbm [shape: bf16[256,128], index: 1, kind: input, shape index: {}]   ;;  %s679_s2 = inlined_call_operand.hbm [shape: bf16[128,256], index: 2, kind: input, shape index: {}]   ;;  %s680_s3 = inlined_call_operand.hbm [shape: f32[16,256], index: 3, kind: output, shape index: {}]  }
   0x1   :  { %9 = vsyncpa [#allocation6], 0 }
   0x2   :  { %10 = vsyncpa [#allocation4], 0  ;;  %s17_s14 = sshll.u32 %s678_s1, 4  ;;  %s627_s15 = smov [#allocation2]   ;;  %s18_s14 = int_to_ptr.hbm [resolvable:$true] %s17_s14 }
   0x3   :  { %s19_s16 = sshll.u32 %s627_s15, 4  ;;  %s30_s19 = sshll.u32 %s679_s2, 4  ;;  %s20_s16 = int_to_ptr.vmem [resolvable:$true] %s19_s16  ;;  %s31_s19 = int_to_ptr.hbm [resolvable:$true] %s30_s19 }
   0x4   :  { %s628_s20 = smov 64   ;;  %s629_s21 = smov 4  }
   0x5   :  { %25 = dma.hbm_to_vmem [thread:$0]  %s18_s14, 2048, %s20_s16, [#allocation3], %s628_s20, %s628_s20, %s629_s21  }
   0x6   :  { %s630_s22 = smov [#allocation5]   ;;  %s631_s24 = smov 128  }
   0x7   :  { %s32_s23 = sshll.u32 %s630_s22, 4  ;;  %s632_s25 = smov 8   ;;  %s33_s23 = int_to_ptr.vmem [resolvable:$true] %s32_s23 }
   0x8   :  { %38 = dma.hbm_to_vmem [thread:$0]  %s31_s19, 2048, %s33_s23, [#allocation6], %s631_s24, %s631_s24, %s632_s25  }
   0x9   :  { %621 = dma.done.wait [#allocation3], 2048  }
   0xa   :  { %622 = vsyncadd [#allocation3], 4294965248 }
   0xb   :  { %623 = dma.done.wait [#allocation6], 2048  }
   0xc   :  { %624 = vsyncadd [#allocation6], 4294965248  ;;  %v515_v0 = vld [vmem:[#allocation2 + $0x38] sm:$0xff]  ;;  %v514_v2 = vld [vmem:[#allocation2 + $0x30] sm:$0xff]  ;;  %s356_s8 = sshll.u32 %s680_s3, 4  ;;  %s634_s9 = smov 256   ;;  %s357_s8 = int_to_ptr.hbm [resolvable:$true] %s356_s8 }
   0xd   :  { %v523_v1 = vld [vmem:[#allocation2 + $0x78] sm:$0xff]  ;;  %187 = vmatpush.bf16.msra.mxu0 %v515_v0  ;;  %v522_v3 = vld [vmem:[#allocation2 + $0x70] sm:$0xff]  ;;  %v513_v4 = vld [vmem:[#allocation2 + $0x28] sm:$0xff]  ;;  %s635_s10 = smov 16  }
   0xe   :  { %201 = vmatpush.bf16.msra.mxu1 %v523_v1  ;;  %v521_v5 = vld [vmem:[#allocation2 + $0x68] sm:$0xff]  ;;  %v500_v6 = vld [vmem:[#allocation5 + $0x70] sm:$0xf]  ;;  %v539_v7 = vld [vmem:[#allocation5 + $0x74] sm:$0xf0] }
   0xf   :  { %v538_v8 = vld [vmem:[#allocation5 + $0x74] sm:$0xf]  ;;  %v502_v9 = vld [vmem:[#allocation5 + $0x78] sm:$0xf0]  ;;  %v501_v10 = vor.u32 %v539_v7, %v500_v6  ;;  %v492_v12 = vld [vmem:[#allocation5 + $0x60] sm:$0xf] }
  0x10   :  { %v505_v11 = vor.u32 %v538_v8, %v502_v9  ;;  %v537_v13 = vld [vmem:[#allocation5 + $0x64] sm:$0xf0]  ;;  %v536_v14 = vld [vmem:[#allocation5 + $0x64] sm:$0xf]  ;;  %v494_v15 = vld [vmem:[#allocation5 + $0x68] sm:$0xf0] }
  0x11   :  { %188 = vmatpush.bf16.msra.mxu0 %v514_v2  ;;  %v512_v16 = vld [vmem:[#allocation2 + $0x20] sm:$0xff]  ;;  %314 = vmatpush.bf16.msra.mxu2 %v501_v10  ;;  %v493_v18 = vor.u32 %v537_v13, %v492_v12  ;;  %v497_v19 = vor.u32 %v536_v14, %v494_v15  ;;  %v484_v20 = vld [vmem:[#allocation5 + $0x50] sm:$0xf]  ;;  %v535_v21 = vld [vmem:[#allocation5 + $0x54] sm:$0xf0] }
  0x12   :  { %202 = vmatpush.bf16.msra.mxu1 %v522_v3  ;;  %v520_v17 = vld [vmem:[#allocation2 + $0x60] sm:$0xff]  ;;  %328 = vmatpush.bf16.msra.mxu3 %v505_v11  ;;  %v534_v22 = vld [vmem:[#allocation5 + $0x54] sm:$0xf]  ;;  %v486_v23 = vld [vmem:[#allocation5 + $0x58] sm:$0xf0]  ;;  %v485_v26 = vor.u32 %v535_v21, %v484_v20 }
  0x13   :  { %v511_v24 = vld [vmem:[#allocation2 + $0x18] sm:$0xff]  ;;  %v489_v27 = vor.u32 %v534_v22, %v486_v23  ;;  %v476_v28 = vld [vmem:[#allocation5 + $0x40] sm:$0xf]  ;;  %v533_v29 = vld [vmem:[#allocation5 + $0x44] sm:$0xf0] }
  0x14   :  { %v519_v25 = vld [vmem:[#allocation2 + $0x58] sm:$0xff]  ;;  %v532_v30 = vld [vmem:[#allocation5 + $0x44] sm:$0xf]  ;;  %v478_v31 = vld [vmem:[#allocation5 + $0x48] sm:$0xf0]  ;;  %v477_v34 = vor.u32 %v533_v29, %v476_v28 }
  0x15   :  { %189 = vmatpush.bf16.msra.mxu0 %v513_v4  ;;  %315 = vmatpush.bf16.msra.mxu2 %v493_v18  ;;  %v510_v32 = vld [vmem:[#allocation2 + $0x10] sm:$0xff]  ;;  %v481_v35 = vor.u32 %v532_v30, %v478_v31  ;;  %v509_v36 = vld [vmem:[#allocation2 + $0x8] sm:$0xff]  ;;  %v508_v38 = vld [vmem:[#allocation2] sm:$0xff] }
  0x16   :  { %203 = vmatpush.bf16.msra.mxu1 %v521_v5  ;;  %329 = vmatpush.bf16.msra.mxu3 %v497_v19  ;;  %v518_v33 = vld [vmem:[#allocation2 + $0x50] sm:$0xff]  ;;  %v517_v37 = vld [vmem:[#allocation2 + $0x48] sm:$0xff]  ;;  %v516_v39 = vld [vmem:[#allocation2 + $0x40] sm:$0xff] }
  0x17   :  { %v372_v40 = vld [vmem:[%s677_s0] sm:$0xf]  ;;  %v507_v41 = vld [vmem:[%s677_s0 + $0x4] sm:$0xf0]  ;;  %v506_v42 = vld [vmem:[%s677_s0 + $0x4] sm:$0xf] }
  0x18   :  { %v374_v43 = vld [vmem:[%s677_s0 + $0x8] sm:$0xf0]  ;;  %v373_v44 = vor.u32 %v507_v41, %v372_v40  ;;  %v468_v46 = vld [vmem:[#allocation5 + $0x30] sm:$0xf]  ;;  %v531_v47 = vld [vmem:[#allocation5 + $0x34] sm:$0xf0] }
  0x19   :  { %190 = vmatpush.bf16.msra.mxu0 %v512_v16  ;;  %316 = vmatpush.bf16.msra.mxu2 %v485_v26  ;;  %v377_v45 = vor.u32 %v506_v42, %v374_v43  ;;  %v530_v48 = vld [vmem:[#allocation5 + $0x34] sm:$0xf]  ;;  %v469_v49 = vor.u32 %v531_v47, %v468_v46  ;;  %v470_v50 = vld [vmem:[#allocation5 + $0x38] sm:$0xf0]  ;;  %v460_v52 = vld [vmem:[#allocation5 + $0x20] sm:$0xf] }
  0x1a   :  { %204 = vmatpush.bf16.msra.mxu1 %v520_v17  ;;  %330 = vmatpush.bf16.msra.mxu3 %v489_v27  ;;  %v473_v51 = vor.u32 %v530_v48, %v470_v50  ;;  %v529_v53 = vld [vmem:[#allocation5 + $0x24] sm:$0xf0]  ;;  %v528_v54 = vld [vmem:[#allocation5 + $0x24] sm:$0xf]  ;;  %v462_v56 = vld [vmem:[#allocation5 + $0x28] sm:$0xf0] }
  0x1b   :  { %v461_v55 = vor.u32 %v529_v53, %v460_v52  ;;  %v465_v57 = vor.u32 %v528_v54, %v462_v56  ;;  %v452_v58 = vld [vmem:[#allocation5 + $0x10] sm:$0xf]  ;;  %v527_v59 = vld [vmem:[#allocation5 + $0x14] sm:$0xf0]  ;;  %v526_v60 = vld [vmem:[#allocation5 + $0x14] sm:$0xf] }
  0x1c   :  { %v453_v61 = vor.u32 %v527_v59, %v452_v58  ;;  %v454_v62 = vld [vmem:[#allocation5 + $0x18] sm:$0xf0]  ;;  %v444_v0 = vld [vmem:[#allocation5] sm:$0xf]  ;;  %v525_v1 = vld [vmem:[#allocation5 + $0x4] sm:$0xf0] }
  0x1d   :  { %191 = vmatpush.bf16.msra.mxu0 %v511_v24  ;;  %317 = vmatpush.bf16.msra.mxu2 %v477_v34  ;;  %v457_v63 = vor.u32 %v526_v60, %v454_v62  ;;  %v524_v2 = vld [vmem:[#allocation5 + $0x4] sm:$0xf]  ;;  %v445_v3 = vor.u32 %v525_v1, %v444_v0  ;;  %v446_v4 = vld [vmem:[#allocation5 + $0x8] sm:$0xf0]  ;;  %s633_s0 = smov [#allocation7]  }
  0x1e   :  { %205 = vmatpush.bf16.msra.mxu1 %v519_v25  ;;  %331 = vmatpush.bf16.msra.mxu3 %v481_v35  ;;  %v449_v5 = vor.u32 %v524_v2, %v446_v4  ;;  %s354_s5 = sshll.u32 %s633_s0, 4  ;;  %s355_s5 = int_to_ptr.vmem [resolvable:$true] %s354_s5 }
  0x21   :  { %192 = vmatpush.bf16.msra.mxu0 %v510_v32  ;;  %318 = vmatpush.bf16.msra.mxu2 %v469_v49 }
  0x22   :  { %206 = vmatpush.bf16.msra.mxu1 %v518_v33  ;;  %332 = vmatpush.bf16.msra.mxu3 %v473_v51 }
  0x25   :  { %193 = vmatpush.bf16.msra.mxu0 %v509_v36  ;;  %319 = vmatpush.bf16.msra.mxu2 %v461_v55 }
  0x26   :  { %207 = vmatpush.bf16.msra.mxu1 %v517_v37  ;;  %333 = vmatpush.bf16.msra.mxu3 %v465_v57 }
  0x29   :  { %194 = vmatpush.bf16.msra.mxu0 %v508_v38  ;;  %320 = vmatpush.bf16.msra.mxu2 %v453_v61 }
  0x2a   :  { %208 = vmatpush.bf16.msra.mxu1 %v516_v39  ;;  %334 = vmatpush.bf16.msra.mxu3 %v457_v63 }
  0x2c   :  { %195 = vmatmul.bf16.vlgmr.msra.gmra.mxu0 %v373_v44 }
  0x2d   :  { %209 = vmatmul.bf16.vlgmr.msra.gmra.mxu1 %v377_v45  ;;  %321 = vmatpush.bf16.msra.mxu2 %v445_v3 }
  0x2e   :  { %335 = vmatpush.bf16.msra.mxu3 %v449_v5 }
  0xa9   :  { %v196_v6 = vpop.f32.mrf.mxu0 }
  0xaa   :  { %v210_v7 = vpop.f32.mrf.mxu1 }
  0xab   :  { %v211_v8 = vadd.f32 %v210_v7, %v196_v6 }
  0xad   :  { %v215_v12 = vmax.f32 %v211_v8, 0.0 }
  0xb1   :  { %v198_v9 = vpop.f32.mrf.mxu0 }
  0xb2   :  { %v212_v10 = vpop.f32.mrf.mxu1 }
  0xb3   :  { %v213_v11 = vadd.f32 %v212_v10, %v198_v9 }
  0xb5   :  { %v216_v13 = vmax.f32 %v213_v11, 0.0 }
  0xb7   :  { %v217_v14 = vpack.c.bf16 %v216_v13, %v215_v12 }
  0xb9   :  { %322 = vmatmul.bf16.vlgmr.msra.gmra.mxu2 %v217_v14  ;;  %336 = vmatmul.bf16.vlgmr.msra.gmra.mxu3 %v217_v14 }
 0x13c   :  { %v323_v15 = vpop.f32.mrf.mxu2  ;;  %v337_v16 = vpop.f32.mrf.mxu3 }
 0x13d   :  { %v342_v17 = vmax.f32 %v323_v15, 0.0  ;;  %v343_v18 = vmax.f32 %v337_v16, 0.0 }
 0x13f   :  { %346 = vst [vmem:[#allocation7] sm:$0xff] %v342_v17 }
 0x140   :  { %347 = vst [vmem:[#allocation7 + $0x8] sm:$0xff] %v343_v18 }
 0x144   :  { %v325_v19 = vpop.f32.mrf.mxu2  ;;  %v339_v20 = vpop.f32.mrf.mxu3 }
 0x145   :  { %v344_v21 = vmax.f32 %v325_v19, 0.0  ;;  %v345_v22 = vmax.f32 %v339_v20, 0.0 }
 0x147   :  { %348 = vst [vmem:[#allocation7 + $0x10] sm:$0xff] %v344_v21 }
 0x148   :  { %349 = vst [vmem:[#allocation7 + $0x18] sm:$0xff] %v345_v22 }
 0x149   :  { %362 = dma.vmem_to_hbm [thread:$0]  %s355_s5, 512, %s357_s8, [#allocation4], %s634_s9, %s634_s9, %s635_s10  }
 0x14a   :  { %625 = dma.done.wait [#allocation4], 512  }
 0x14b   :  { %626 = vsyncadd [#allocation4], 4294966784 }
 0x14c   :  { %367 = vsyncpa [#allocation3], 1 }
 0x14d   :  { %368 = vsyncpa [#allocation6], 1 }
 0x14e   :  { %369 = vsyncpa [#allocation4], 1 }

</bundles_post_ra>
